<compile_context>
chip_gen: v7x
topology: tpu7x:2x2x1
jax: 0.10.0
libtpu: 0.0.40
codegen_flags: <defaults>
</compile_context>

<pallas_src>
import jax
import jax.numpy as jnp
from jax import lax
from jax.experimental import pallas as pl
from jax.experimental.pallas import tpu as pltpu

_SUB = 8      # sublane granularity
_LANE = 128   # lane granularity


def _round_up(x: int, m: int) -> int:
    return ((x + m - 1) // m) * m


def _cdiv(a: int, b: int) -> int:
    return (a + b - 1) // b


def _vmem_capacity_bytes() -> int:
    try:
        info = pltpu.get_tpu_info()
        cap = getattr(info, "vmem_capacity_bytes", None)
        if cap:
            return int(cap)
    except Exception:
        pass
    return 128 * 1024 * 1024  # v5e/v6e default


def _logreg_kernel(x_ref, w_ref, b_ref, o_ref):
    # x_ref : (TB, D_in)   VMEM  batch tile
    # w_ref : (TN, D_in)   VMEM  weight tile (PyTorch layout, resident when TN==D_out)
    # b_ref : (1, TN)      VMEM
    # o_ref : (TB, TN)     VMEM
    # x @ W.T on the MXU with f32 accumulation (no wrapper-side transpose).
    z = lax.dot_general(
        x_ref[...], w_ref[...],
        dimension_numbers=(((1,), (1,)), ((), ())),
        preferred_element_type=jnp.float32,
    )
    z = z + b_ref[...]
    # sigmoid(z) = 0.5 * tanh(0.5 * z) + 0.5 : single EUP tanh, VPU mul/add.
    o_ref[...] = (0.5 * jnp.tanh(0.5 * z) + 0.5).astype(o_ref.dtype)


def logistic_regression(x, weight, bias, *,
                        compute_dtype=jnp.float32,
                        out_dtype=jnp.float32):
    """x: (B, D_in); weight: (D_out, D_in); bias: (D_out,). Returns (B, D_out)."""
    B, D_in = x.shape
    D_out = weight.shape[0]
    assert weight.shape == (D_out, D_in) and bias.shape == (D_out,)

    # Wrapper-side cast (never inside the kernel per-tile).  Default f32; on
    # v6e/v7x pass compute_dtype=jnp.bfloat16 to halve W/x HBM traffic (loosen
    # tolerances to ~1e-2 in that case).  Accumulation stays f32 either way.
    if x.dtype != compute_dtype:
        x = x.astype(compute_dtype)
    if weight.dtype != compute_dtype:
        weight = weight.astype(compute_dtype)
    bias = bias.astype(jnp.float32)
    itemsize = jnp.dtype(compute_dtype).itemsize
    out_itemsize = jnp.dtype(out_dtype).itemsize

    # ---- per-generation VMEM budget ----------------------------------------
    phys_vmem = _vmem_capacity_bytes()
    budget = int(phys_vmem * 0.75)          # ~96 MiB v5e/v6e, ~48 MiB v7x
    tile_budget = int(budget * 0.90)        # headroom for compiler scratch

    # ---- output-feature tiling: keep the whole weight resident if it fits ---
    w_row_vmem = _round_up(D_in, _LANE) * itemsize           # one padded W row
    full_w_vmem = 2 * _round_up(D_out, _SUB) * w_row_vmem    # double-buffered
    if full_w_vmem <= tile_budget // 2:
        TN = D_out                                           # W fully resident
    else:
        # TODO(synk): for very large D_in also tile the contraction (K) axis
        # with a VMEM f32 accumulator and pl.when init/finalize ("arbitrary").
        TN = max(_LANE, ((tile_budget // 2) // (2 * w_row_vmem)) // _LANE * _LANE)
        TN = min(TN, _round_up(D_out, _LANE))
    n_n = _cdiv(D_out, TN)

    # ---- batch tiling from the remaining budget -----------------------------
    w_resident = 2 * _round_up(TN, _SUB) * w_row_vmem
    x_row = _round_up(D_in, _LANE) * itemsize
    o_row = _round_up(TN, _LANE) * out_itemsize
    per_row = 2 * (x_row + o_row)                            # double-buffered
    avail = max(tile_budget - w_resident - (1 << 20), per_row * _SUB)
    TB = max(_SUB, (avail // per_row) // _SUB * _SUB)
    TB = min(TB, _round_up(B, _SUB))
    n_b = _cdiv(B, TB)
    # Give v7x's two TensorCores at least two batch tiles when B is large.
    if n_b == 1 and B >= 1024:
        TB = _round_up(_cdiv(B, 2), _SUB)
        n_b = _cdiv(B, TB)

    bias2 = bias.reshape(1, D_out)

    cost = pl.CostEstimate(
        flops=2 * B * D_in * D_out,
        transcendentals=B * D_out,
        bytes_accessed=(B * D_in * itemsize + D_out * D_in * itemsize
                        + D_out * 4 + B * D_out * out_itemsize),
    )

    # Grid: (n, b) with batch innermost -> each W tile is DMA'd once and stays
    # resident while all batch tiles stream past it (when n_n == 1, W is loaded
    # exactly once for the whole kernel).  Both axes are independent.
    out = pl.pallas_call(
        _logreg_kernel,
        out_shape=jax.ShapeDtypeStruct((B, D_out), out_dtype),
        grid_spec=pltpu.PrefetchScalarGridSpec(
            num_scalar_prefetch=0,
            grid=(n_n, n_b),
            in_specs=[
                pl.BlockSpec((TB, D_in), lambda n, b: (b, 0)),   # batch tile
                pl.BlockSpec((TN, D_in), lambda n, b: (n, 0)),   # weight tile
                pl.BlockSpec((1, TN),    lambda n, b: (0, n)),   # bias tile
            ],
            out_specs=pl.BlockSpec((TB, TN), lambda n, b: (b, n)),
        ),
        compiler_params=pltpu.CompilerParams(
            dimension_semantics=("parallel", "parallel"),
            vmem_limit_bytes=budget,
        ),
        cost_estimate=cost,
    )(x, weight, bias2)

    return out


if __name__ == "__main__":
    # Small shapes implied by the module: batch=8, input_dim=32, output_dim=16.
    B, D_in, D_out = 8, 32, 16
    key = jax.random.PRNGKey(0)
    kx, kw, kb = jax.random.split(key, 3)

    x = jax.random.normal(kx, (B, D_in), dtype=jnp.float32)
    bound = 1.0 / jnp.sqrt(jnp.float32(D_in))
    weight = jax.random.uniform(kw, (D_out, D_in), jnp.float32, -bound, bound)
    bias = jax.random.uniform(kb, (D_out,), jnp.float32, -bound, bound)

    out = logistic_regression(x, weight, bias)
    out = jax.block_until_ready(out)

    # Cross-check against plain-JAX reference.
    ref = jax.nn.sigmoid(x @ weight.T + bias)
    assert out.shape == (B, D_out)
    assert jnp.allclose(out, ref, atol=1e-5, rtol=1e-5)

    print("KERNEL_OK")
</pallas_src>

<mosaic_0001>
module attributes {stable_mosaic.version = 11 : i64} {
  func.func @_logreg_kernel(%arg0: i32, %arg1: i32, %arg2: memref<8x32xf32, #tpu.memory_space<vmem>>, %arg3: memref<16x32xf32, #tpu.memory_space<vmem>>, %arg4: memref<1x16xf32, #tpu.memory_space<vmem>>, %arg5: memref<8x16xf32, #tpu.memory_space<vmem>>) attributes {dimension_semantics = [#tpu.dimension_semantics<parallel>, #tpu.dimension_semantics<parallel>], iteration_bounds = array<i64: 1, 1>, scalar_prefetch = 0 : i64, scratch_operands = 0 : i64, tpu.core_type = #tpu.core_type<tc>, window_params = [{transform_indices = @transform_0, window_bounds = array<i64: 8, 32>}, {transform_indices = @transform_1, window_bounds = array<i64: 16, 32>}, {transform_indices = @transform_2, window_bounds = array<i64: 1, 16>}, {transform_indices = @transform_3, window_bounds = array<i64: 8, 16>}]} {
    %c0 = arith.constant 0 : index
    %c0_0 = arith.constant 0 : index
    %0 = vector.load %arg2[%c0, %c0_0] : memref<8x32xf32, #tpu.memory_space<vmem>>, vector<8x32xf32>
    %c0_1 = arith.constant 0 : index
    %c0_2 = arith.constant 0 : index
    %1 = vector.load %arg3[%c0_1, %c0_2] : memref<16x32xf32, #tpu.memory_space<vmem>>, vector<16x32xf32>
    %cst = arith.constant dense<0.000000e+00> : vector<8x16xf32>
    %2 = tpu.matmul %0, %1, %cst {dimension_numbers = #tpu.dot_dimension_numbers<[1], [1], [0], [0], [0, 0, 1, 0], [], []>} : vector<8x32xf32>, vector<16x32xf32>, vector<8x16xf32> -> vector<8x16xf32>
    %c0_3 = arith.constant 0 : index
    %c0_4 = arith.constant 0 : index
    %3 = vector.load %arg4[%c0_3, %c0_4] : memref<1x16xf32, #tpu.memory_space<vmem>>, vector<1x16xf32>
    %4 = vector.broadcast %3 : vector<1x16xf32> to vector<8x16xf32>
    %5 = arith.addf %2, %4 : vector<8x16xf32>
    %cst_5 = arith.constant 5.000000e-01 : f32
    %6 = vector.broadcast %cst_5 : f32 to vector<8x16xf32>
    %7 = arith.mulf %6, %5 : vector<8x16xf32>
    %8 = math.tanh %7 : vector<8x16xf32>
    %cst_6 = arith.constant 5.000000e-01 : f32
    %9 = vector.broadcast %cst_6 : f32 to vector<8x16xf32>
    %10 = arith.mulf %9, %8 : vector<8x16xf32>
    %cst_7 = arith.constant 5.000000e-01 : f32
    %11 = vector.broadcast %cst_7 : f32 to vector<8x16xf32>
    %12 = arith.addf %10, %11 : vector<8x16xf32>
    %c0_8 = arith.constant 0 : index
    %c0_9 = arith.constant 0 : index
    %13 = vector.load %arg5[%c0_8, %c0_9] : memref<8x16xf32, #tpu.memory_space<vmem>>, vector<8x16xf32>
    tpu.vector_store %arg5[%c0_8, %c0_9], %12 {strides = array<i32>} : memref<8x16xf32, #tpu.memory_space<vmem>>, vector<8x16xf32>,
    return
  }
  func.func @transform_0(%arg0: i32, %arg1: i32) -> (i32, i32) {
    %c0_i32 = arith.constant 0 : i32
    %c0_i32_0 = arith.constant 0 : i32
    return %arg1, %c0_i32 : i32, i32
  }
  func.func @transform_1(%arg0: i32, %arg1: i32) -> (i32, i32) {
    %c0_i32 = arith.constant 0 : i32
    %c0_i32_0 = arith.constant 0 : i32
    return %arg0, %c0_i32 : i32, i32
  }
  func.func @transform_2(%arg0: i32, %arg1: i32) -> (i32, i32) {
    %c0_i32 = arith.constant 0 : i32
    %c0_i32_0 = arith.constant 0 : i32
    return %c0_i32, %arg0 : i32, i32
  }
  func.func @transform_3(%arg0: i32, %arg1: i32) -> (i32, i32) {
    %c0_i32 = arith.constant 0 : i32
    return %arg1, %arg0 : i32, i32
  }
}

</mosaic_0001>

<bundles_post_ra>
// kernel: tpu_custom_call.1
= control target key start
LH: loop header
LB: loop body
LE: loop exit
PB: predicated region body
PF: predicated region fallthrough
CT: control target
= control target key end

     0   :  { %8 = vsyncpa [#allocation3], 0  ;;  %s364_s0 = inlined_call_operand.hbm [shape: f32[8,32], index: 0, kind: input, shape index: {}]   ;;  %s365_s1 = inlined_call_operand.hbm [shape: f32[16,32], index: 1, kind: input, shape index: {}]   ;;  %s366_s2 = inlined_call_operand.hbm [shape: f32[1,16], index: 2, kind: input, shape index: {}]   ;;  %s367_s3 = inlined_call_operand.hbm [shape: f32[8,16], index: 3, kind: output, shape index: {}]  }
   0x1   :  { %9 = vsyncpa [#allocation6], 0 }
   0x2   :  { %10 = vsyncpa [#allocation4], 0  ;;  %s287_s12 = smov [#allocation5]   ;;  %s193_s16 = scalar_lea.hbm %s365_s1, 256 }
   0x3   :  { %s26_s13 = sshll.u32 %s287_s12, 4  ;;  %p194_p0 = scmp.ne.s32.totalorder %s365_s1, %s193_s16  ;;  %s27_s13 = int_to_ptr.vmem [resolvable:$true] %s26_s13 }
   0x4   :  { %p197_p1 = scmp.lt.u32.totalorder %s193_s16, %s365_s1 }
   0x6   :  { %p199_p2 = pnand %p197_p1, %p194_p0 }
   0x8   :  { %202 = shalt.err (!%p199_p2)
}
   0x9   :  { %s203_s21 = scalar_lea.vmem %s27_s13, 256  ;;  %p208_p4 = scmp.lt.s32.totalorder %s27_s13, %s27_s13 }
   0xa   :  { %p204_p3 = scmp.ne.s32.totalorder %s27_s13, %s203_s21  ;;  %p209_p5 = scmp.lt.s32.totalorder %s203_s21, %s203_s21 }
   0xc   :  { %p210_p6 = por %p209_p5, %p208_p4 }
   0xe   :  { %p211_p7 = pnand %p210_p6, %p204_p3 }
  0x10   :  { %214 = shalt.err (!%p211_p7)
}
  0x11   :  { %s288_s22 = smov 128   ;;  %s289_s23 = smov 8  }
  0x12   :  { %32 = dma.hbm_to_vmem [thread:$0]  %s365_s1, 256, %s27_s13, [#allocation6], %s288_s22, %s288_s22, %s289_s23  }
  0x13   :  { %s290_s26 = smov [#allocation2]   ;;  %s291_s28 = smov [#allocation7]  }
  0x14   :  { %s17_s27 = sshll.u32 %s290_s26, 4  ;;  %s39_s29 = sshll.u32 %s291_s28, 4  ;;  %s18_s27 = int_to_ptr.vmem [resolvable:$true] %s17_s27  ;;  %s40_s29 = int_to_ptr.vmem [resolvable:$true] %s39_s29 }
  0x15   :  { %s215_s5 = scalar_lea.hbm %s364_s0, 128 }
  0x16   :  { %p216_p8 = scmp.ne.s32.totalorder %s364_s0, %s215_s5  ;;  %p219_p9 = scmp.lt.u32.totalorder %s215_s5, %s364_s0 }
  0x18   :  { %p221_p10 = pnand %p219_p9, %p216_p8 }
  0x1a   :  { %224 = shalt.err (!%p221_p10)
}
  0x1b   :  { %s225_s1 = scalar_lea.vmem %s18_s27, 128  ;;  %p230_p12 = scmp.lt.s32.totalorder %s18_s27, %s18_s27 }
  0x1c   :  { %p226_p11 = scmp.ne.s32.totalorder %s18_s27, %s225_s1  ;;  %p231_p13 = scmp.lt.s32.totalorder %s225_s1, %s225_s1 }
  0x1e   :  { %p232_p0 = por %p231_p13, %p230_p12 }
  0x20   :  { %p233_p1 = pnand %p232_p0, %p226_p11 }
  0x22   :  { %236 = shalt.err (!%p233_p1)
}
  0x23   :  { %20 = dma.hbm_to_vmem [thread:$0]  %s364_s0, 128, %s18_s27, [#allocation3]  }
  0x24   :  { %s237_s14 = scalar_lea.hbm %s366_s2, 16 }
  0x25   :  { %p238_p2 = scmp.ne.s32.totalorder %s366_s2, %s237_s14  ;;  %p241_p3 = scmp.lt.u32.totalorder %s237_s14, %s366_s2 }
  0x27   :  { %p243_p4 = pnand %p241_p3, %p238_p2 }
  0x29   :  { %246 = shalt.err (!%p243_p4)
}
  0x2a   :  { %s247_s19 = scalar_lea.vmem %s40_s29, 16  ;;  %s251_s20 = scalar_lea.vmem %s40_s29, 32 }
  0x2b   :  { %p248_p5 = scmp.ne.s32.totalorder %s40_s29, %s247_s19  ;;  %p252_p6 = scmp.lt.s32.totalorder %s40_s29, %s40_s29 }
  0x2c   :  { %p253_p7 = scmp.lt.s32.totalorder %s251_s20, %s247_s19 }
  0x2e   :  { %p254_p8 = por %p253_p7, %p252_p6 }
  0x30   :  { %p255_p9 = pnand %p254_p8, %p248_p5 }
  0x32   :  { %258 = shalt.err (!%p255_p9)
}
  0x33   :  { %42 = dma.hbm_to_vmem [thread:$0]  %s366_s2, 16, %s40_s29, [#allocation6]  }
  0x34   :  { %281 = dma.done.wait [#allocation3], 128  }
  0x35   :  { %282 = vsyncadd [#allocation3], 4294967168 }
  0x36   :  { %283 = dma.done.wait [#allocation6], 272  }
  0x37   :  { %284 = vsyncadd [#allocation6], 4294967024  ;;  %v292_v0 = vmov 0.0|0.0   ;;  %vm293_vm0 = vmmov 0   ;;  %v294_v1 = vmov 0.0   ;;  %vm62_vm1 = vcmask 261120  }
  0x38   :  { %178 = vmatprep.subr.bf16.mxu0 %v292_v0  ;;  %175 = vmatprep.mubr.msk.f32.mxu0 %vm293_vm0, %v294_v1  ;;  %v53_v2 = vld [vmem:[#allocation5] sm:$0xff]  ;;  %v54_v3 = vld [vmem:[#allocation5 + $0x8] sm:$0xff]  ;;  %vm180_vm2 = vmpackc.low %vm62_vm1, %vm62_vm1  ;;  %s295_s2 = smov [#allocation8]   ;;  %vm146_vm3 = vcmask 130048  }
  0x39   :  { %v179_v4 = vpack.c.bf16 %v54_v3, %v53_v2  ;;  %v52_v5 = vld [vmem:[#allocation2] sm:$0xff]  ;;  %v164_v6 = vld [vmem:[#allocation7] ss:$0 sm:$0xff]  ;;  %s154_s22 = sshll.u32 %s295_s2, 4  ;;  %s155_s22 = int_to_ptr.vmem [resolvable:$true] %s154_s22 }
  0x3a   :  { %s259_s23 = scalar_lea.vmem %s155_s22, 128  ;;  %p264_p11 = scmp.lt.s32.totalorder %s155_s22, %s155_s22 }
  0x3b   :  { %181 = vmatpush3.bf16.xpose.msk.msra.mxu0 %vm180_vm2, %v179_v4  ;;  %p260_p10 = scmp.ne.s32.totalorder %s155_s22, %s259_s23  ;;  %p265_p12 = scmp.lt.s32.totalorder %s259_s23, %s259_s23 }
  0x3d   :  { %p266_p13 = por %p265_p12, %p264_p11 }
  0x3f   :  { %p267_p0 = pnand %p266_p13, %p260_p10 }
  0x42   :  { %176 = vmatmul.mubr.msk.f32.vlgmr.msra.gmra.mrb[0].mxu0 %vm62_vm1, %v52_v5 }
 0x115   :  { %v138_v7 = vpop.f32.mrb[0].mxu0 }
 0x116   :  { %v139_v8 = vadd.f32 %v164_v6, %v138_v7  ;;  %v177_v9 = vpop.f32.mrb[1].mxu0 }
 0x118   :  { %v142_v10 = vmul.f32 0.5, %v139_v8 }
 0x11a   :  { %191 = vtanh.f32 %v142_v10 }
 0x124   :  { %v192_v11 = vpop.eup %191 }
 0x125   :  { %v144_v12 = vmul.f32 0.5, %v192_v11 }
 0x127   :  { %v145_v13 = vadd.f32 0.5, %v144_v12 }
 0x129   :  { %147 = vst.msk [vmem:[#allocation8] sm:$0xff] %vm146_vm3, %v145_v13 }
 0x12a   :  { %270 = shalt.err (!%p267_p0)
}
 0x12b   :  { %s271_s26 = scalar_lea.hbm %s367_s3, 128 }
 0x12c   :  { %p272_p1 = scmp.ne.s32.totalorder %s367_s3, %s271_s26  ;;  %p275_p2 = scmp.lt.u32.totalorder %s271_s26, %s367_s3 }
 0x12e   :  { %p277_p3 = pnand %p275_p2, %p272_p1 }
 0x130   :  { %280 = shalt.err (!%p277_p3)
}
 0x131   :  { %157 = dma.vmem_to_hbm [thread:$0]  %s155_s22, 128, %s367_s3, [#allocation4]  }
 0x132   :  { %285 = dma.done.wait [#allocation4], 128  }
 0x133   :  { %286 = vsyncadd [#allocation4], 4294967168 }
 0x134   :  { %161 = vsyncpa [#allocation3], 1 }
 0x135   :  { %162 = vsyncpa [#allocation6], 1 }
 0x136   :  { %163 = vsyncpa [#allocation4], 1 }

</bundles_post_ra>
